<compile_context>
chip_gen: v7x
topology: tpu7x:2x2x1
jax: 0.10.0
libtpu: 0.0.40
codegen_flags: <defaults>
</compile_context>

<pallas_src>
import jax
import jax.numpy as jnp
from jax.experimental import pallas as pl
from jax.experimental.pallas import tpu as pltpu


BN_EPS = 1e-5

# Packed parameter slab row indices (each row is lane-0 aligned).
ROW_G1X, ROW_B1X = 0, 1     # bn1 gamma/beta for the raw-input part
ROW_G1F, ROW_B1F = 2, 3     # bn1 gamma/beta for the feature part
ROW_G2, ROW_B2 = 4, 5       # bn2 gamma/beta
ROW_FC2B = 6                # fc2 bias
P_ROWS = 8                  # one full sublane tile


def _round_up(n, m):
    return (n + m - 1) // m * m


def _respiratory_kernel(
    x_ref,    # (B, Dxp)       raw input part (Dxp = input_dim padded to mult. of 8)
    f_ref,    # (B, Df)        feature part
    p_ref,    # (8, Wmax)      packed scale/shift/bias slab (see ROW_* above)
    w1_ref,   # (Dxp+Df, H)    fc1 weight, (in, out) layout (fc1 bias intentionally absent)
    w2_ref,   # (H, C)         fc2 weight, (in, out) layout
    o_ref,    # (B, C)         output
):
    Dxp = x_ref.shape[1]
    Df = f_ref.shape[1]
    H = w1_ref.shape[1]
    C = o_ref.shape[1]

    p = p_ref[...]            # (8, Wmax)

    def bn_relu(v, gamma, beta):
        # Training-mode BatchNorm1d (biased batch variance), single-pass stats,
        # affine pre-fused into (1,N) scale/shift -> one mul + one add on (B,N).
        ex = jnp.mean(v, axis=0, keepdims=True)
        ex2 = jnp.mean(v * v, axis=0, keepdims=True)
        var = jnp.maximum(ex2 - ex * ex, 0.0)
        scale = gamma * jax.lax.rsqrt(var + BN_EPS)   # (1, N)
        shift = beta - ex * scale                     # (1, N)
        return jnp.maximum(v * scale + shift, 0.0)

    # ---- bn1 + ReLU, applied per concat-part (exact: BN is per-column).
    # Padded x columns have gamma=beta=0 in the slab -> they stay exactly 0.
    hx = bn_relu(x_ref[...],
                 p[ROW_G1X:ROW_G1X + 1, :Dxp], p[ROW_B1X:ROW_B1X + 1, :Dxp])
    hf = bn_relu(f_ref[...],
                 p[ROW_G1F:ROW_G1F + 1, :Df], p[ROW_B1F:ROW_B1F + 1, :Df])

    # ---- fc1 (split matmul replaces the concat; Dxp % 8 == 0 keeps both
    # slices zero-cost views; fc1 bias is cancelled by bn2's batch mean) ----
    h = (jnp.dot(hx, w1_ref[:Dxp, :], preferred_element_type=jnp.float32)
         + jnp.dot(hf, w1_ref[Dxp:, :], preferred_element_type=jnp.float32))

    # ---- bn2 + ReLU ----
    h = bn_relu(h, p[ROW_G2:ROW_G2 + 1, :H], p[ROW_B2:ROW_B2 + 1, :H])

    # ---- fc2 + bias + ReLU ----
    out = (jnp.dot(h, w2_ref[...], preferred_element_type=jnp.float32)
           + p[ROW_FC2B:ROW_FC2B + 1, :C])
    o_ref[...] = jnp.maximum(out, 0.0)


def prepare_params(params, input_dim, feature_dim):
    """One-time parameter prep (keep OUT of the per-call path):
      * fc1/fc2 weights transposed to (in, out); fc1's x-part rows zero-padded
        so input_dim rounds up to a multiple of 8 (sublane-tile-safe split).
      * bn1 (pre-split per concat-part), bn2 and fc2 bias packed into one
        (8, Wmax) lane-0-aligned slab -> a single DMA instead of three.
      * fc1 bias deliberately dropped: with bn2 in training mode it is
        mathematically cancelled by the batch-mean subtraction.
    """
    f32 = jnp.float32
    Dx, Df = input_dim, feature_dim
    fc1_w = jnp.asarray(params["fc1_w"], f32)       # (H, D)  PyTorch layout
    fc2_w = jnp.asarray(params["fc2_w"], f32)       # (C, H)
    H, C = fc1_w.shape[0], fc2_w.shape[0]
    Dxp = _round_up(Dx, 8)

    # fc1 weight -> (in, out); zero-pad the x-part rows up to Dxp.
    w1 = fc1_w.T                                    # (D, H)
    w1_x = jnp.zeros((Dxp, H), f32).at[:Dx].set(w1[:Dx])
    w1_packed = jnp.concatenate([w1_x, w1[Dx:]], axis=0)   # (Dxp + Df, H)

    w2 = fc2_w.T                                    # (H, C)

    g1 = jnp.asarray(params["bn1_w"], f32)
    b1 = jnp.asarray(params["bn1_b"], f32)
    g2 = jnp.asarray(params["bn2_w"], f32)
    b2 = jnp.asarray(params["bn2_b"], f32)
    fc2_b = jnp.asarray(params["fc2_b"], f32)

    wmax = max(Dxp, Df, H, C)
    slab = jnp.zeros((P_ROWS, wmax), f32)
    slab = slab.at[ROW_G1X, :Dx].set(g1[:Dx])
    slab = slab.at[ROW_B1X, :Dx].set(b1[:Dx])
    slab = slab.at[ROW_G1F, :Df].set(g1[Dx:])
    slab = slab.at[ROW_B1F, :Df].set(b1[Dx:])
    slab = slab.at[ROW_G2, :H].set(g2)
    slab = slab.at[ROW_B2, :H].set(b2)
    slab = slab.at[ROW_FC2B, :C].set(fc2_b)

    return {"p": slab, "w1": w1_packed, "w2": w2, "dx": Dx, "dx_pad": Dxp}


def respiratory_regression_forward(x, feature, prepped):
    """Pallas forward for RespiratoryRegression (training-mode BatchNorm).

    x:       (B, input_dim)   float32 (other float dtypes are upcast once)
    feature: (B, feature_dim) float32, feature_dim >= 1
    prepped: output of prepare_params()
    """
    # TODO(synk): feature_dim == 0 (the module's default) needs a single-input
    # kernel variant; this kernel assumes feature_dim >= 1.
    B = x.shape[0]
    H, C = prepped["w2"].shape
    Dx, Dxp = prepped["dx"], prepped["dx_pad"]
    Df = feature.shape[1]
    D = Dxp + Df

    # Only cast when the caller didn't already supply f32 (static dtype check,
    # so no extra HLO convert in the common case).
    if x.dtype != jnp.float32:
        x = x.astype(jnp.float32)
    if feature.dtype != jnp.float32:
        feature = feature.astype(jnp.float32)
    if Dxp != Dx:
        x = jnp.pad(x, ((0, 0), (0, Dxp - Dx)))

    operands = (x, feature, prepped["p"], prepped["w1"], prepped["w2"])

    flops = 2 * B * D * H + 2 * B * H * C + 10 * B * (D + H + C)
    bytes_accessed = 4 * (x.size + feature.size + prepped["p"].size
                          + prepped["w1"].size + prepped["w2"].size + B * C)
    cost = pl.CostEstimate(flops=flops,
                           transcendentals=Dxp + Df + H,      # per-column rsqrt
                           bytes_accessed=bytes_accessed)

    vmem_spec = pl.BlockSpec(memory_space=pltpu.MemorySpace.VMEM)

    return pl.pallas_call(
        _respiratory_kernel,
        out_shape=jax.ShapeDtypeStruct((B, C), jnp.float32),
        in_specs=[vmem_spec] * len(operands),
        out_specs=vmem_spec,
        cost_estimate=cost,
    )(*operands)


def init_params(key, input_dim, feature_dim, num_classes, hidden=50):
    """Deterministic synthetic parameters matching the module's __init__ shapes
    (PyTorch layout: Linear weights are (out_features, in_features))."""
    D = input_dim + feature_dim
    k1, k2, k3, k4, k5, k6 = jax.random.split(key, 6)
    return {
        "bn1_w": 1.0 + 0.1 * jax.random.normal(k1, (D,), jnp.float32),
        "bn1_b": 0.05 * jax.random.normal(k2, (D,), jnp.float32),
        "bn2_w": 1.0 + 0.1 * jax.random.normal(k3, (hidden,), jnp.float32),
        "bn2_b": 0.05 * jax.random.normal(k4, (hidden,), jnp.float32),
        "fc1_w": jax.random.normal(k5, (hidden, D), jnp.float32) / jnp.sqrt(D),
        "fc1_b": jnp.linspace(-0.1, 0.1, hidden, dtype=jnp.float32),  # cancelled by bn2
        "fc2_w": jax.random.normal(k6, (num_classes, hidden), jnp.float32) / jnp.sqrt(hidden),
        "fc2_b": jnp.linspace(-0.05, 0.05, num_classes, dtype=jnp.float32),
    }


if __name__ == "__main__":
    # Small shapes consistent with the module: fc1 input = input_dim + feature_dim,
    # hidden is fixed at 50 by the module definition.
    B = 8
    INPUT_DIM = 40
    FEATURE_DIM = 10       # input_dim + feature_dim = 50 == bn1 size
    NUM_CLASSES = 10

    key = jax.random.PRNGKey(0)
    kx, kf, kp = jax.random.split(key, 3)
    x = jax.random.normal(kx, (B, INPUT_DIM), jnp.float32)
    feature = jax.random.normal(kf, (B, FEATURE_DIM), jnp.float32)
    params = init_params(kp, INPUT_DIM, FEATURE_DIM, NUM_CLASSES)
    prepped = prepare_params(params, INPUT_DIM, FEATURE_DIM)   # one-time prep

    out = respiratory_regression_forward(x, feature, prepped)
    out = jax.block_until_ready(out)
    assert out.shape == (B, NUM_CLASSES), out.shape
    print("KERNEL_OK")
</pallas_src>

<mosaic_0001>
module attributes {stable_mosaic.version = 11 : i64} {
  func.func @_respiratory_kernel(%arg0: memref<8x40xf32, #tpu.memory_space<vmem>>, %arg1: memref<8x10xf32, #tpu.memory_space<vmem>>, %arg2: memref<8x50xf32, #tpu.memory_space<vmem>>, %arg3: memref<50x50xf32, #tpu.memory_space<vmem>>, %arg4: memref<50x10xf32, #tpu.memory_space<vmem>>, %arg5: memref<8x10xf32, #tpu.memory_space<vmem>>) attributes {dimension_semantics = [], scalar_prefetch = 0 : i64, scratch_operands = 0 : i64, tpu.core_type = #tpu.core_type<tc>} {
    %c0 = arith.constant 0 : index
    %c0_0 = arith.constant 0 : index
    %0 = vector.load %arg2[%c0, %c0_0] : memref<8x50xf32, #tpu.memory_space<vmem>>, vector<8x50xf32>
    %c0_1 = arith.constant 0 : index
    %c0_2 = arith.constant 0 : index
    %1 = vector.load %arg0[%c0_1, %c0_2] : memref<8x40xf32, #tpu.memory_space<vmem>>, vector<8x40xf32>
    %2 = vector.extract_strided_slice %0 {offsets = [0, 0], sizes = [1, 40], strides = [1, 1]} : vector<8x50xf32> to vector<1x40xf32>
    %3 = vector.extract_strided_slice %0 {offsets = [1, 0], sizes = [1, 40], strides = [1, 1]} : vector<8x50xf32> to vector<1x40xf32>
    %cst = arith.constant dense<0.000000e+00> : vector<40xf32>
    %4 = vector.multi_reduction <add>, %1, %cst [0] : vector<8x40xf32> to vector<40xf32>
    %5 = vector.shape_cast %4 : vector<40xf32> to vector<1x40xf32>
    %cst_3 = arith.constant 8.000000e+00 : f32
    %6 = vector.broadcast %cst_3 : f32 to vector<1x40xf32>
    %7 = arith.divf %5, %6 : vector<1x40xf32>
    %8 = arith.mulf %1, %1 : vector<8x40xf32>
    %cst_4 = arith.constant dense<0.000000e+00> : vector<40xf32>
    %9 = vector.multi_reduction <add>, %8, %cst_4 [0] : vector<8x40xf32> to vector<40xf32>
    %10 = vector.shape_cast %9 : vector<40xf32> to vector<1x40xf32>
    %cst_5 = arith.constant 8.000000e+00 : f32
    %11 = vector.broadcast %cst_5 : f32 to vector<1x40xf32>
    %12 = arith.divf %10, %11 : vector<1x40xf32>
    %13 = arith.mulf %7, %7 : vector<1x40xf32>
    %14 = arith.subf %12, %13 : vector<1x40xf32>
    %cst_6 = arith.constant 0.000000e+00 : f32
    %15 = vector.broadcast %cst_6 : f32 to vector<1x40xf32>
    %16 = arith.maximumf %14, %15 : vector<1x40xf32>
    %cst_7 = arith.constant 9.99999974E-6 : f32
    %17 = vector.broadcast %cst_7 : f32 to vector<1x40xf32>
    %18 = arith.addf %16, %17 : vector<1x40xf32>
    %19 = math.rsqrt %18 : vector<1x40xf32>
    %20 = arith.mulf %2, %19 : vector<1x40xf32>
    %21 = arith.mulf %7, %20 : vector<1x40xf32>
    %22 = arith.subf %3, %21 : vector<1x40xf32>
    %23 = vector.broadcast %20 : vector<1x40xf32> to vector<8x40xf32>
    %24 = arith.mulf %1, %23 : vector<8x40xf32>
    %25 = vector.broadcast %22 : vector<1x40xf32> to vector<8x40xf32>
    %26 = arith.addf %24, %25 : vector<8x40xf32>
    %cst_8 = arith.constant 0.000000e+00 : f32
    %27 = vector.broadcast %cst_8 : f32 to vector<8x40xf32>
    %28 = arith.maximumf %26, %27 : vector<8x40xf32>
    %c0_9 = arith.constant 0 : index
    %c0_10 = arith.constant 0 : index
    %29 = vector.load %arg1[%c0_9, %c0_10] : memref<8x10xf32, #tpu.memory_space<vmem>>, vector<8x10xf32>
    %30 = vector.extract_strided_slice %0 {offsets = [2, 0], sizes = [1, 10], strides = [1, 1]} : vector<8x50xf32> to vector<1x10xf32>
    %31 = vector.extract_strided_slice %0 {offsets = [3, 0], sizes = [1, 10], strides = [1, 1]} : vector<8x50xf32> to vector<1x10xf32>
    %cst_11 = arith.constant dense<0.000000e+00> : vector<10xf32>
    %32 = vector.multi_reduction <add>, %29, %cst_11 [0] : vector<8x10xf32> to vector<10xf32>
    %33 = vector.shape_cast %32 : vector<10xf32> to vector<1x10xf32>
    %cst_12 = arith.constant 8.000000e+00 : f32
    %34 = vector.broadcast %cst_12 : f32 to vector<1x10xf32>
    %35 = arith.divf %33, %34 : vector<1x10xf32>
    %36 = arith.mulf %29, %29 : vector<8x10xf32>
    %cst_13 = arith.constant dense<0.000000e+00> : vector<10xf32>
    %37 = vector.multi_reduction <add>, %36, %cst_13 [0] : vector<8x10xf32> to vector<10xf32>
    %38 = vector.shape_cast %37 : vector<10xf32> to vector<1x10xf32>
    %cst_14 = arith.constant 8.000000e+00 : f32
    %39 = vector.broadcast %cst_14 : f32 to vector<1x10xf32>
    %40 = arith.divf %38, %39 : vector<1x10xf32>
    %41 = arith.mulf %35, %35 : vector<1x10xf32>
    %42 = arith.subf %40, %41 : vector<1x10xf32>
    %cst_15 = arith.constant 0.000000e+00 : f32
    %43 = vector.broadcast %cst_15 : f32 to vector<1x10xf32>
    %44 = arith.maximumf %42, %43 : vector<1x10xf32>
    %cst_16 = arith.constant 9.99999974E-6 : f32
    %45 = vector.broadcast %cst_16 : f32 to vector<1x10xf32>
    %46 = arith.addf %44, %45 : vector<1x10xf32>
    %47 = math.rsqrt %46 : vector<1x10xf32>
    %48 = arith.mulf %30, %47 : vector<1x10xf32>
    %49 = arith.mulf %35, %48 : vector<1x10xf32>
    %50 = arith.subf %31, %49 : vector<1x10xf32>
    %51 = vector.broadcast %48 : vector<1x10xf32> to vector<8x10xf32>
    %52 = arith.mulf %29, %51 : vector<8x10xf32>
    %53 = vector.broadcast %50 : vector<1x10xf32> to vector<8x10xf32>
    %54 = arith.addf %52, %53 : vector<8x10xf32>
    %cst_17 = arith.constant 0.000000e+00 : f32
    %55 = vector.broadcast %cst_17 : f32 to vector<8x10xf32>
    %56 = arith.maximumf %54, %55 : vector<8x10xf32>
    %c0_18 = arith.constant 0 : index
    %c0_19 = arith.constant 0 : index
    %57 = vector.load %arg3[%c0_18, %c0_19] : memref<50x50xf32, #tpu.memory_space<vmem>>, vector<40x50xf32>
    %cst_20 = arith.constant dense<0.000000e+00> : vector<8x50xf32>
    %58 = tpu.matmul %28, %57, %cst_20 {dimension_numbers = #tpu.dot_dimension_numbers<[1], [0], [0], [1], [0, 0, 1, 1], [], []>} : vector<8x40xf32>, vector<40x50xf32>, vector<8x50xf32> -> vector<8x50xf32>
    %c40 = arith.constant 40 : index
    %c0_21 = arith.constant 0 : index
    %59 = vector.load %arg3[%c40, %c0_21] : memref<50x50xf32, #tpu.memory_space<vmem>>, vector<10x50xf32>
    %cst_22 = arith.constant dense<0.000000e+00> : vector<8x50xf32>
    %60 = tpu.matmul %56, %59, %cst_22 {dimension_numbers = #tpu.dot_dimension_numbers<[1], [0], [0], [1], [0, 0, 1, 1], [], []>} : vector<8x10xf32>, vector<10x50xf32>, vector<8x50xf32> -> vector<8x50xf32>
    %61 = arith.addf %58, %60 : vector<8x50xf32>
    %62 = vector.extract_strided_slice %0 {offsets = [4, 0], sizes = [1, 50], strides = [1, 1]} : vector<8x50xf32> to vector<1x50xf32>
    %63 = vector.extract_strided_slice %0 {offsets = [5, 0], sizes = [1, 50], strides = [1, 1]} : vector<8x50xf32> to vector<1x50xf32>
    %cst_23 = arith.constant dense<0.000000e+00> : vector<50xf32>
    %64 = vector.multi_reduction <add>, %61, %cst_23 [0] : vector<8x50xf32> to vector<50xf32>
    %65 = vector.shape_cast %64 : vector<50xf32> to vector<1x50xf32>
    %cst_24 = arith.constant 8.000000e+00 : f32
    %66 = vector.broadcast %cst_24 : f32 to vector<1x50xf32>
    %67 = arith.divf %65, %66 : vector<1x50xf32>
    %68 = arith.mulf %61, %61 : vector<8x50xf32>
    %cst_25 = arith.constant dense<0.000000e+00> : vector<50xf32>
    %69 = vector.multi_reduction <add>, %68, %cst_25 [0] : vector<8x50xf32> to vector<50xf32>
    %70 = vector.shape_cast %69 : vector<50xf32> to vector<1x50xf32>
    %cst_26 = arith.constant 8.000000e+00 : f32
    %71 = vector.broadcast %cst_26 : f32 to vector<1x50xf32>
    %72 = arith.divf %70, %71 : vector<1x50xf32>
    %73 = arith.mulf %67, %67 : vector<1x50xf32>
    %74 = arith.subf %72, %73 : vector<1x50xf32>
    %cst_27 = arith.constant 0.000000e+00 : f32
    %75 = vector.broadcast %cst_27 : f32 to vector<1x50xf32>
    %76 = arith.maximumf %74, %75 : vector<1x50xf32>
    %cst_28 = arith.constant 9.99999974E-6 : f32
    %77 = vector.broadcast %cst_28 : f32 to vector<1x50xf32>
    %78 = arith.addf %76, %77 : vector<1x50xf32>
    %79 = math.rsqrt %78 : vector<1x50xf32>
    %80 = arith.mulf %62, %79 : vector<1x50xf32>
    %81 = arith.mulf %67, %80 : vector<1x50xf32>
    %82 = arith.subf %63, %81 : vector<1x50xf32>
    %83 = vector.broadcast %80 : vector<1x50xf32> to vector<8x50xf32>
    %84 = arith.mulf %61, %83 : vector<8x50xf32>
    %85 = vector.broadcast %82 : vector<1x50xf32> to vector<8x50xf32>
    %86 = arith.addf %84, %85 : vector<8x50xf32>
    %cst_29 = arith.constant 0.000000e+00 : f32
    %87 = vector.broadcast %cst_29 : f32 to vector<8x50xf32>
    %88 = arith.maximumf %86, %87 : vector<8x50xf32>
    %c0_30 = arith.constant 0 : index
    %c0_31 = arith.constant 0 : index
    %89 = vector.load %arg4[%c0_30, %c0_31] : memref<50x10xf32, #tpu.memory_space<vmem>>, vector<50x10xf32>
    %cst_32 = arith.constant dense<0.000000e+00> : vector<8x10xf32>
    %90 = tpu.matmul %88, %89, %cst_32 {dimension_numbers = #tpu.dot_dimension_numbers<[1], [0], [0], [1], [0, 0, 1, 1], [], []>} : vector<8x50xf32>, vector<50x10xf32>, vector<8x10xf32> -> vector<8x10xf32>
    %91 = vector.extract_strided_slice %0 {offsets = [6, 0], sizes = [1, 10], strides = [1, 1]} : vector<8x50xf32> to vector<1x10xf32>
    %92 = vector.broadcast %91 : vector<1x10xf32> to vector<8x10xf32>
    %93 = arith.addf %90, %92 : vector<8x10xf32>
    %cst_33 = arith.constant 0.000000e+00 : f32
    %94 = vector.broadcast %cst_33 : f32 to vector<8x10xf32>
    %95 = arith.maximumf %93, %94 : vector<8x10xf32>
    %c0_34 = arith.constant 0 : index
    %c0_35 = arith.constant 0 : index
    %96 = vector.load %arg5[%c0_34, %c0_35] : memref<8x10xf32, #tpu.memory_space<vmem>>, vector<8x10xf32>
    tpu.vector_store %arg5[%c0_34, %c0_35], %95 {strides = array<i32>} : memref<8x10xf32, #tpu.memory_space<vmem>>, vector<8x10xf32>,
    return
  }
}

</mosaic_0001>

<bundles_post_ra>
// kernel: tpu_custom_call.1
= control target key start
LH: loop header
LB: loop body
LE: loop exit
PB: predicated region body
PF: predicated region fallthrough
CT: control target
= control target key end

     0   :  { %vm115_vm0 = vcmask 1041408   ;;  %v520_v2 = vmov 0.0|0.0   ;;  %vm521_vm1 = vmmov 1   ;;  %vm65_vm3 = vcmask 80896   ;;  %s674_s0 = inlined_call_operand.vmem [shape: f32[8,40], index: 0, kind: input, shape index: {}]   ;;  %s675_s1 = inlined_call_operand.vmem [shape: f32[8,10], index: 1, kind: input, shape index: {}]   ;;  %s676_s2 = inlined_call_operand.vmem [shape: f32[8,50], index: 2, kind: input, shape index: {}]   ;;  %s677_s3 = inlined_call_operand.vmem [shape: f32[50,50], index: 3, kind: input, shape index: {}]   ;;  %s678_s4 = inlined_call_operand.vmem [shape: f32[50,10], index: 4, kind: input, shape index: {}]   ;;  %s679_s5 = inlined_call_operand.hbm [shape: f32[8,10], index: 5, kind: output, shape index: {}]  }
   0x1   :  { %v110_v0 = vld [vmem:[%s677_s3 + $0x28] sm:$0xff]  ;;  %v111_v1 = vld [vmem:[%s677_s3 + $0x30] sm:$0x3]  ;;  %464 = vmatprep.subr.bf16.mxu0 %v520_v2  ;;  %vm466_vm2 = vmpackc.low %vm115_vm0, %vm521_vm1  ;;  %474 = vmatprep.subr.bf16.mxu1 %v520_v2  ;;  %vm522_vm4 = vmmov 0   ;;  %v523_v5 = vmov 0.0   ;;  %vm23_vm5 = vcmask 326656  }
   0x2   :  { %v465_v3 = vpack.c.bf16 %v111_v1, %v110_v0  ;;  %v566_v4 = vld [vmem:[%s675_s1] sm:$0xff]  ;;  %431 = vmatprep.mubr.msk.f32.mxu0 %vm522_vm4, %v523_v5  ;;  %461 = vmatprep.mubr.msk.f32.mxu1 %vm522_vm4, %v523_v5 }
   0x3   :  { %v66_v6 = vsel %vm65_vm3, %v566_v4, 0.0  ;;  %v74_v7 = vmul.f32 %v566_v4, %v566_v4  ;;  %v580_v9 = vld [vmem:[%s674_s0] sm:$0xff] }
   0x4   :  { %467 = vmatpush3.bf16.msk.msra.mxu0 %vm466_vm2, %v465_v3  ;;  %v67_v8 = vrot.slane %v66_v6, 4 }
   0x5   :  { %468 = vmatprep.subr.bf16.mxu0 %v520_v2  ;;  %v75_v10 = vsel %vm65_vm3, %v74_v7, 0.0 }
   0x6   :  { %10 = vsyncpa [#allocation3], 0  ;;  %v68_v11 = vadd.f32 %v67_v8, %v66_v6  ;;  %v76_v12 = vrot.slane %v75_v10, 4  ;;  %v24_v13 = vsel %vm23_vm5, %v580_v9, 0.0  ;;  %v33_v14 = vmul.f32 %v580_v9, %v580_v9  ;;  %v594_v51 = vld [vmem:[%s676_s2] sm:$0xff]  ;;  %v106_v7 = vld [vmem:[%s677_s3 + $0x8] sm:$0xff] }
   0x7   :  { %v25_v15 = vrot.slane %v24_v13, 4  ;;  %v53_v48 = vlaneseq  ;;  %v105_v6 = vld [vmem:[%s677_s3] sm:$0xff]  ;;  %vm262_vm6 = vcmask 408576  }
   0x8   :  { %v69_v16 = vrot.slane %v68_v11, 2  ;;  %v77_v17 = vadd.f32 %v76_v12, %v75_v10  ;;  %v34_v18 = vsel %vm23_vm5, %v33_v14, 0.0 }
   0x9   :  { %v26_v19 = vadd.f32 %v25_v15, %v24_v13  ;;  %v35_v20 = vrot.slane %v34_v18, 4  ;;  %v589_v50 = vshrl.u32 %v53_v48, 7  ;;  %v469_v13 = vpack.c.bf16 %v106_v7, %v105_v6  ;;  %v108_v15 = vld [vmem:[%s677_s3 + $0x18] sm:$0xff] }
   0xa   :  { %v70_v21 = vadd.f32 %v69_v16, %v68_v11  ;;  %v78_v22 = vrot.slane %v77_v17, 2 }
   0xb   :  { %v27_v23 = vrot.slane %v26_v19, 2  ;;  %v36_v24 = vadd.f32 %v35_v20, %v34_v18  ;;  %v96_v52 = vsub.s32 2, %v589_v50  ;;  %v101_v60 = vsub.s32 3, %v589_v50  ;;  %v109_v20 = vld [vmem:[%s677_s3 + $0x20] sm:$0xff] }
   0xc   :  { %v71_v25 = vrot.slane %v70_v21, 1  ;;  %v79_v26 = vadd.f32 %v78_v22, %v77_v17  ;;  %v55_v61 = vsub.s32 0, %v589_v50  ;;  %v60_v10 = vsub.s32 1, %v589_v50  ;;  %v303_v22 = vld [vmem:[%s678_s4 + $0x8] sm:$0xff] }
   0xd   :  { %v28_v27 = vadd.f32 %v27_v23, %v26_v19  ;;  %v37_v28 = vrot.slane %v36_v24, 2 }
   0xe   :  { %v72_v29 = vadd.f32 %v71_v25, %v70_v21  ;;  %v80_v30 = vrot.slane %v79_v26, 1  ;;  %v305_v25 = vld [vmem:[%s678_s4 + $0x18] sm:$0xff] }
   0xf   :  { %v29_v31 = vrot.slane %v28_v27, 1  ;;  %v38_v32 = vadd.f32 %v37_v28, %v36_v24  ;;  %v304_v24 = vld [vmem:[%s678_s4 + $0x10] sm:$0xff]  ;;  %v307_v28 = vld [vmem:[%s678_s4 + $0x28] sm:$0xff] }
  0x10   :  { %v73_v33 = vmul.f32 0.125, %v72_v29  ;;  %v81_v34 = vadd.f32 %v80_v30, %v79_v26  ;;  %v478_v26 = vpack.c.bf16 %v305_v25, %v304_v24  ;;  %v308_v30 = vld [vmem:[%s678_s4 + $0x30] sm:$0x3] }
  0x11   :  { %v30_v35 = vadd.f32 %v29_v31, %v28_v27  ;;  %v39_v36 = vrot.slane %v38_v32, 1  ;;  %v306_v27 = vld [vmem:[%s678_s4 + $0x20] sm:$0xff] }
  0x12   :  { %v82_v37 = vmul.f32 0.125, %v81_v34  ;;  %v83_v38 = vmul.f32 %v73_v33, %v73_v33  ;;  %v481_v29 = vpack.c.bf16 %v307_v28, %v306_v27 }
  0x13   :  { %v32_v39 = vmul.f32 0.125, %v30_v35  ;;  %v40_v40 = vadd.f32 %v39_v36, %v38_v32 }
  0x14   :  { %v84_v41 = vsub.f32 %v82_v37, %v83_v38 }
  0x15   :  { %v41_v42 = vmul.f32 0.125, %v40_v40  ;;  %v42_v43 = vmul.f32 %v32_v39, %v32_v39 }
  0x16   :  { %v85_v44 = vmax.f32 %v84_v41, 0.0 }
  0x17   :  { %v43_v45 = vsub.f32 %v41_v42, %v42_v43 }
  0x18   :  { %v86_v46 = vadd.f32 1e-05, %v85_v44 }
  0x19   :  { %v44_v47 = vmax.f32 %v43_v45, 0.0 }
  0x1a   :  { %490 = vrsqrt.f32 %v86_v46 }
  0x1b   :  { %v45_v49 = vadd.f32 1e-05, %v44_v47 }
  0x1d   :  { %492 = vrsqrt.f32 %v45_v49 }
  0x24   :  { %v491_v53 = vpop.eup %490 }
  0x25   :  { %v88_v54 = vmul.f32 %v491_v53, %v594_v51 }
  0x27   :  { %v493_v55 = vpop.eup %492  ;;  %v89_v56 = vmul.f32 %v88_v54, %v73_v33  ;;  %v97_v57 = vrot.slane %v88_v54, %v96_v52 }
  0x28   :  { %v47_v58 = vmul.f32 %v493_v55, %v594_v51 }
  0x29   :  { %v91_v59 = vrot.slane %v89_v56, 7  ;;  %v98_v0 = vmul.f32 %v97_v57, %v566_v4  ;;  %v107_v4 = vld [vmem:[%s677_s3 + $0x10] sm:$0xff]  ;;  %v293_v56 = vsub.s32 4, %v589_v50 }
  0x2a   :  { %v48_v62 = vmul.f32 %v47_v58, %v32_v39  ;;  %v56_v8 = vrot.slane %v47_v58, %v55_v61  ;;  %v472_v18 = vpack.c.bf16 %v108_v15, %v107_v4 }
  0x2b   :  { %v93_v63 = vsub.f32 %v594_v51, %v91_v59 }
  0x2c   :  { %v50_v1 = vrot.slane %v48_v62, 7  ;;  %v57_v16 = vmul.f32 %v56_v8, %v580_v9  ;;  %v302_v9 = vld [vmem:[%s678_s4] sm:$0xff]  ;;  %s524_s4 = smov [#allocation2]  }
  0x2d   :  { %v102_v3 = vrot.slane %v93_v63, %v101_v60  ;;  %v475_v23 = vpack.c.bf16 %v303_v22, %v302_v9  ;;  %v298_v60 = vsub.s32 5, %v589_v50  ;;  %s397_s23 = sshll.u32 %s524_s4, 4  ;;  %s398_s23 = int_to_ptr.vmem [resolvable:$true] %s397_s23 }
  0x2e   :  { %v52_v11 = vsub.f32 %v594_v51, %v50_v1  ;;  %s496_s1 = scalar_lea.vmem %s398_s23, 128  ;;  %p501_p1 = scmp.lt.s32.totalorder %s398_s23, %s398_s23 }
  0x2f   :  { %v103_v12 = vadd.f32 %v102_v3, %v98_v0  ;;  %476 = vmatpush3.bf16.msra.mxu1 %v475_v23  ;;  %v311_v3 = vsub.s32 6, %v589_v50  ;;  %p497_p0 = scmp.ne.s32.totalorder %s398_s23, %s496_s1  ;;  %p502_p2 = scmp.lt.s32.totalorder %s496_s1, %s496_s1 }
  0x30   :  { %v61_v17 = vrot.slane %v52_v11, %v60_v10  ;;  %477 = vmatprep.subr.bf16.mxu1 %v520_v2 }
  0x31   :  { %v104_v14 = vmax.f32 %v103_v12, 0.0  ;;  %v312_v6 = vrot.slane %v594_v51, %v311_v3  ;;  %p503_p3 = por %p502_p2, %p501_p1 }
  0x32   :  { %v62_v19 = vadd.f32 %v61_v17, %v57_v16 }
  0x33   :  { %432 = vmatmul.mubr.msk.f32.vlgmr.msra.gmra.mrb[0].mxu0 %vm65_vm3, %v104_v14  ;;  %479 = vmatpush3.bf16.msra.mxu1 %v478_v26  ;;  %p504_p4 = pnand %p503_p3, %p497_p0 }
  0x34   :  { %470 = vmatpush3.bf16.msra.mxu0 %v469_v13  ;;  %444 = vmatprep.mubr.msk.f32.mxu0 %vm522_vm4, %v523_v5  ;;  %v63_v21 = vmax.f32 %v62_v19, 0.0 }
  0x35   :  { %471 = vmatprep.subr.bf16.mxu0 %v520_v2  ;;  %480 = vmatprep.subr.bf16.mxu1 %v520_v2 }
  0x37   :  { %482 = vmatpush3.bf16.msra.mxu1 %v481_v29 }
  0x38   :  { %473 = vmatpush3.bf16.msra.mxu0 %v472_v18  ;;  %459 = vmatprep.subr.mxu1 %v523_v5 }
  0x39   :  { %442 = vmatprep.subr.mxu0 %v523_v5 }
  0x3b   :  { %460 = vmatpush3.msk.msra.mxu1 %vm115_vm0, %v308_v30 }
  0x3c   :  { %443 = vmatpush3.msra.mxu0 %v109_v20 }
  0x3d   :  { %445 = vmatmul.mubr.msk.f32.vlgmr.msra.gmra.mrb[0].mxu0 %vm23_vm5, %v63_v21 }
 0x110   :  { %v258_v2 = vpop.f32.mrb[0].mxu0 }
 0x111   :  { %v263_v31 = vsel %vm262_vm6, %v258_v2, 0.0  ;;  %v271_v32 = vmul.f32 %v258_v2, %v258_v2  ;;  %v446_v33 = vpop.f32.mrb[1].mxu0 }
 0x112   :  { %v264_v34 = vrot.slane %v263_v31, 4 }
 0x113   :  { %v272_v35 = vsel %vm262_vm6, %v271_v32, 0.0 }
 0x114   :  { %v265_v36 = vadd.f32 %v264_v34, %v263_v31  ;;  %v273_v37 = vrot.slane %v272_v35, 4 }
 0x116   :  { %v266_v38 = vrot.slane %v265_v36, 2  ;;  %v274_v39 = vadd.f32 %v273_v37, %v272_v35 }
 0x118   :  { %v267_v5 = vadd.f32 %v266_v38, %v265_v36  ;;  %v275_v40 = vrot.slane %v274_v39, 2 }
 0x11a   :  { %v268_v41 = vrot.slane %v267_v5, 1  ;;  %v276_v42 = vadd.f32 %v275_v40, %v274_v39 }
 0x11c   :  { %v269_v43 = vadd.f32 %v268_v41, %v267_v5  ;;  %v277_v44 = vrot.slane %v276_v42, 1 }
 0x11e   :  { %v270_v45 = vmul.f32 0.125, %v269_v43  ;;  %v278_v46 = vadd.f32 %v277_v44, %v276_v42 }
 0x120   :  { %v279_v47 = vmul.f32 0.125, %v278_v46  ;;  %v280_v48 = vmul.f32 %v270_v45, %v270_v45 }
 0x122   :  { %v281_v49 = vsub.f32 %v279_v47, %v280_v48 }
 0x124   :  { %v282_v52 = vmax.f32 %v281_v49, 0.0 }
 0x126   :  { %v283_v53 = vadd.f32 1e-05, %v282_v52 }
 0x128   :  { %494 = vrsqrt.f32 %v283_v53 }
 0x132   :  { %v495_v54 = vpop.eup %494 }
 0x133   :  { %v285_v55 = vmul.f32 %v495_v54, %v594_v51 }
 0x135   :  { %v286_v57 = vmul.f32 %v285_v55, %v270_v45  ;;  %v294_v59 = vrot.slane %v285_v55, %v293_v56 }
 0x137   :  { %v288_v58 = vrot.slane %v286_v57, 7  ;;  %v295_v62 = vmul.f32 %v294_v59, %v258_v2 }
 0x139   :  { %v290_v61 = vsub.f32 %v594_v51, %v288_v58 }
 0x13b   :  { %v299_v63 = vrot.slane %v290_v61, %v298_v60 }
 0x13d   :  { %v300_v0 = vadd.f32 %v299_v63, %v295_v62 }
 0x13f   :  { %v301_v1 = vmax.f32 %v300_v0, 0.0 }
 0x141   :  { %462 = vmatmul.mubr.msk.f32.vlgmr.msra.gmra.mrb[0].mxu1 %vm262_vm6, %v301_v1 }
 0x214   :  { %v385_v7 = vpop.f32.mrb[0].mxu1 }
 0x215   :  { %v386_v8 = vadd.f32 %v385_v7, %v312_v6  ;;  %v463_v10 = vpop.f32.mrb[1].mxu1 }
 0x217   :  { %v389_v11 = vmax.f32 %v386_v8, 0.0 }
 0x219   :  { %390 = vst.msk [vmem:[#allocation2] sm:$0xff] %vm65_vm3, %v389_v11 }
 0x21a   :  { %507 = shalt.err (!%p504_p4)
}
 0x21b   :  { %s508_s25 = scalar_lea.hbm %s679_s5, 128 }
 0x21c   :  { %p509_p5 = scmp.ne.s32.totalorder %s679_s5, %s508_s25  ;;  %p512_p6 = scmp.lt.u32.totalorder %s508_s25, %s679_s5 }
 0x21e   :  { %p514_p7 = pnand %p512_p6, %p509_p5 }
 0x220   :  { %517 = shalt.err (!%p514_p7)
}
 0x221   :  { %400 = dma.vmem_to_hbm [thread:$0]  %s398_s23, 128, %s679_s5, [#allocation3]  }
 0x222   :  { %518 = dma.done.wait [#allocation3], 128  }
 0x223   :  { %519 = vsyncadd [#allocation3], 4294967168 }
 0x224   :  { %404 = vsyncpa [#allocation3], 1 }

</bundles_post_ra>
